<compile_context>
chip_gen: v7x
topology: tpu7x:2x2x1
jax: 0.10.0
libtpu: 0.0.40
codegen_flags: <defaults>
</compile_context>

<pallas_src>
import functools

import jax
import jax.numpy as jnp
from jax.experimental import pallas as pl
from jax.experimental.pallas import tpu as pltpu


def mlp_kernel(x_ref, w1_ref, b1_ref, w2_ref, b2_ref, w3_ref, b3_ref, o_ref,
               *, tile_b, batch):
    # x_ref: (TB, IN) batch-major tile; w*: (out, in); b*: (out, 1); o_ref: (1, TB).
    x = x_ref[...]
    if batch % tile_b != 0:
        # The last tile sticks out past the true batch.  Pallas masks the OOB
        # output writes; zero the undefined input rows so nothing unspecified
        # flows through the math.
        rows = (jax.lax.broadcasted_iota(jnp.int32, x.shape, 0)
                + pl.program_id(0) * tile_b)
        x = jnp.where(rows < batch, x, 0.0)

    # Layer 1: Linear(22 -> H) + ReLU.  Contract the feature axes of (H, IN) and
    # (TB, IN) -> feature-major (H, TB); the on-chip "transpose" of the tile is
    # absorbed into the matmul, and the batch rides the 128-wide lane axis.
    h = jax.lax.dot_general(w1_ref[...], x, (((1,), (1,)), ((), ())),
                            preferred_element_type=jnp.float32)
    h = jnp.maximum(h + b1_ref[...], 0.0)

    # Layer 2: Linear(H -> H) + ReLU -> (H, TB)
    h = jnp.dot(w2_ref[...], h, preferred_element_type=jnp.float32)
    h = jnp.maximum(h + b2_ref[...], 0.0)

    # Output layer: Linear(H -> 1) + exact Sigmoid -> (1, TB), lane-dense store.
    z = jnp.dot(w3_ref[...], h, preferred_element_type=jnp.float32) + b3_ref[...]
    o_ref[...] = (1.0 / (1.0 + jnp.exp(-z))).astype(o_ref.dtype)


def _round_up(n, m):
    return ((n + m - 1) // m) * m


def mlp_forward(x, params, *, force_pallas=False, min_pallas_batch=1024):
    """x: (B, 22) batch-major (PyTorch convention). Returns (B, 1) sigmoid probs."""
    w1, b1, w2, b2, w3, b3 = params
    B, IN = x.shape
    H = w1.shape[0]

    # Tiny batches: a single fused XLA kernel is strictly cheaper than the
    # pallas_call launch + 7 input DMAs.
    if B < min_pallas_batch and not force_pallas:
        h = jnp.maximum(x @ w1.T + b1.T, 0.0)
        h = jnp.maximum(h @ w2.T + b2.T, 0.0)
        return jax.nn.sigmoid(h @ w3.T + b3.T)

    LANE = 128
    MAX_TB = 8192  # (8192, 22) f32 lane-pads to ~4 MiB per VMEM buffer.
    if B <= LANE:
        TB = LANE
    else:
        # Big tiles to amortize per-step overhead, but always >= 2 tiles so the
        # "parallel" grid axis can shard across both v7x TensorCores.
        TB = min(MAX_TB, _round_up(pl.cdiv(B, 2), LANE))
    num_tiles = pl.cdiv(B, TB)

    def resident(shape):
        # Whole weight / bias array, same block every grid step -> stays in VMEM.
        return pl.BlockSpec(shape, lambda i, _nd=len(shape): (0,) * _nd)

    param_bytes = sum(int(p.size) for p in params) * 4
    cost = pl.CostEstimate(
        flops=2 * B * (IN * H + H * H + H) + 6 * B * H,
        transcendentals=B,                                 # one exp per sample
        bytes_accessed=(B * IN + B) * 4 + param_bytes,
    )

    out_fm = pl.pallas_call(
        functools.partial(mlp_kernel, tile_b=TB, batch=B),
        out_shape=jax.ShapeDtypeStruct((1, B), jnp.float32),
        grid=(num_tiles,),
        in_specs=[
            pl.BlockSpec((TB, IN), lambda i: (i, 0)),      # batch-major x tile, pipelined
            resident(w1.shape), resident(b1.shape),
            resident(w2.shape), resident(b2.shape),
            resident(w3.shape), resident(b3.shape),
        ],
        out_specs=pl.BlockSpec((1, TB), lambda i: (0, i)),  # lane-dense output
        compiler_params=pltpu.CompilerParams(
            dimension_semantics=("parallel",),              # shard tiles across TCs (v7x)
            vmem_limit_bytes=32 * 1024 * 1024,
        ),
        cost_estimate=cost,
    )(x, w1, b1, w2, b2, w3, b3)

    # Back to PyTorch-style (B, 1).
    return out_fm.T


def init_params(key, in_features=22, hidden=32, out_features=1):
    # PyTorch nn.Linear default init: U(-1/sqrt(fan_in), 1/sqrt(fan_in)).
    # Weights in PyTorch (out, in) layout; biases as (out, 1) columns so they
    # broadcast over the lane (batch) axis inside the feature-major kernel.
    def linear(k, fan_in, fan_out):
        kw, kb = jax.random.split(k)
        bound = 1.0 / jnp.sqrt(fan_in)
        w = jax.random.uniform(kw, (fan_out, fan_in), jnp.float32, -bound, bound)
        b = jax.random.uniform(kb, (fan_out, 1), jnp.float32, -bound, bound)
        return w, b

    k1, k2, k3 = jax.random.split(key, 3)
    w1, b1 = linear(k1, in_features, hidden)
    w2, b2 = linear(k2, hidden, hidden)
    w3, b3 = linear(k3, hidden, out_features)
    return (w1, b1, w2, b2, w3, b3)


if __name__ == "__main__":
    key = jax.random.PRNGKey(0)
    kx, kp = jax.random.split(key)

    IN, H = 22, 32   # nn_config = {'hidden_layer_width': 32, 'depth': 3}
    params = init_params(kp, in_features=IN, hidden=H, out_features=1)
    w1, b1, w2, b2, w3, b3 = params

    def reference(xx):
        h = jnp.maximum(xx @ w1.T + b1.T, 0.0)
        h = jnp.maximum(h @ w2.T + b2.T, 0.0)
        return jax.nn.sigmoid(h @ w3.T + b3.T)

    # Tolerance covers TPU default f32 matmul precision (bf16 passes); the
    # sigmoid itself is exact now.
    TOL = 3e-3

    # 1) Tiny batch -> fused XLA fallback path.
    x_small = jax.random.normal(kx, (8, IN), jnp.float32)
    out_small = jax.block_until_ready(mlp_forward(x_small, params))
    assert out_small.shape == (8, 1)
    assert jnp.allclose(out_small, reference(x_small), atol=TOL, rtol=0.0), \
        float(jnp.abs(out_small - reference(x_small)).max())

    # 2) Force the Pallas kernel on a batch that is NOT a multiple of 128
    #    (exercises the 2-tile parallel grid and the masked partial edge tile).
    x_med = jax.random.normal(jax.random.PRNGKey(1), (200, IN), jnp.float32)
    out_med = jax.block_until_ready(mlp_forward(x_med, params, force_pallas=True))
    assert out_med.shape == (200, 1)
    assert jnp.allclose(out_med, reference(x_med), atol=TOL, rtol=0.0), \
        float(jnp.abs(out_med - reference(x_med)).max())

    # 3) Natural Pallas path (B >= min_pallas_batch), two 1024-wide tiles.
    x_big = jax.random.normal(jax.random.PRNGKey(2), (2048, IN), jnp.float32)
    out_big = jax.block_until_ready(mlp_forward(x_big, params))
    assert out_big.shape == (2048, 1)
    assert jnp.allclose(out_big, reference(x_big), atol=TOL, rtol=0.0), \
        float(jnp.abs(out_big - reference(x_big)).max())

    print("KERNEL_OK")
</pallas_src>

<mosaic_0001>
module attributes {stable_mosaic.version = 11 : i64} {
  func.func @mlp_kernel(%arg0: i32, %arg1: memref<128x22xf32, #tpu.memory_space<vmem>>, %arg2: memref<32x22xf32, #tpu.memory_space<vmem>>, %arg3: memref<32x1xf32, #tpu.memory_space<vmem>>, %arg4: memref<32x32xf32, #tpu.memory_space<vmem>>, %arg5: memref<32x1xf32, #tpu.memory_space<vmem>>, %arg6: memref<1x32xf32, #tpu.memory_space<vmem>>, %arg7: memref<1x1xf32, #tpu.memory_space<vmem>>, %arg8: memref<1x128xf32, #tpu.memory_space<vmem>>) attributes {dimension_semantics = [#tpu.dimension_semantics<parallel>], iteration_bounds = array<i64: 2>, scalar_prefetch = 0 : i64, scratch_operands = 0 : i64, tpu.core_type = #tpu.core_type<tc>, window_params = [{transform_indices = @transform_0, window_bounds = array<i64: 128, 22>}, {pipeline_mode = #tpu.pipeline_mode<synchronous>, transform_indices = @transform_1, window_bounds = array<i64: 32, 22>}, {pipeline_mode = #tpu.pipeline_mode<synchronous>, transform_indices = @transform_2, window_bounds = array<i64: 32, 1>}, {pipeline_mode = #tpu.pipeline_mode<synchronous>, transform_indices = @transform_3, window_bounds = array<i64: 32, 32>}, {pipeline_mode = #tpu.pipeline_mode<synchronous>, transform_indices = @transform_4, window_bounds = array<i64: 32, 1>}, {pipeline_mode = #tpu.pipeline_mode<synchronous>, transform_indices = @transform_5, window_bounds = array<i64: 1, 32>}, {pipeline_mode = #tpu.pipeline_mode<synchronous>, transform_indices = @transform_6, window_bounds = array<i64: 1, 1>}, {transform_indices = @transform_7, window_bounds = array<i64: 1, 128>}]} {
    %c0 = arith.constant 0 : index
    %c0_0 = arith.constant 0 : index
    %0 = vector.load %arg1[%c0, %c0_0] : memref<128x22xf32, #tpu.memory_space<vmem>>, vector<128x22xf32>
    %1 = tpu.iota {dimensions = array<i32: 0>} : vector<128x22xi32>
    %c128_i32 = arith.constant 128 : i32
    %2 = arith.muli %arg0, %c128_i32 : i32
    %3 = vector.broadcast %2 : i32 to vector<128x22xi32>
    %4 = arith.addi %1, %3 : vector<128x22xi32>
    %c200_i32 = arith.constant 200 : i32
    %5 = vector.broadcast %c200_i32 : i32 to vector<128x22xi32>
    %6 = arith.cmpi slt, %4, %5 : vector<128x22xi32>
    %cst = arith.constant 0.000000e+00 : f32
    %7 = vector.broadcast %cst : f32 to vector<128x22xf32>
    %8 = arith.select %6, %0, %7 : vector<128x22xi1>, vector<128x22xf32>
    %c0_1 = arith.constant 0 : index
    %c0_2 = arith.constant 0 : index
    %9 = vector.load %arg2[%c0_1, %c0_2] : memref<32x22xf32, #tpu.memory_space<vmem>>, vector<32x22xf32>
    %cst_3 = arith.constant dense<0.000000e+00> : vector<32x128xf32>
    %10 = tpu.matmul %9, %8, %cst_3 {dimension_numbers = #tpu.dot_dimension_numbers<[1], [1], [0], [0], [0, 0, 1, 0], [], []>} : vector<32x22xf32>, vector<128x22xf32>, vector<32x128xf32> -> vector<32x128xf32>
    %c0_4 = arith.constant 0 : index
    %c0_5 = arith.constant 0 : index
    %11 = vector.load %arg3[%c0_4, %c0_5] : memref<32x1xf32, #tpu.memory_space<vmem>>, vector<32x1xf32>
    %12 = vector.broadcast %11 : vector<32x1xf32> to vector<32x128xf32>
    %13 = arith.addf %10, %12 : vector<32x128xf32>
    %cst_6 = arith.constant 0.000000e+00 : f32
    %14 = vector.broadcast %cst_6 : f32 to vector<32x128xf32>
    %15 = arith.maximumf %13, %14 : vector<32x128xf32>
    %c0_7 = arith.constant 0 : index
    %c0_8 = arith.constant 0 : index
    %16 = vector.load %arg4[%c0_7, %c0_8] : memref<32x32xf32, #tpu.memory_space<vmem>>, vector<32x32xf32>
    %cst_9 = arith.constant dense<0.000000e+00> : vector<32x128xf32>
    %17 = tpu.matmul %16, %15, %cst_9 {dimension_numbers = #tpu.dot_dimension_numbers<[1], [0], [0], [1], [0, 0, 1, 1], [], []>} : vector<32x32xf32>, vector<32x128xf32>, vector<32x128xf32> -> vector<32x128xf32>
    %c0_10 = arith.constant 0 : index
    %c0_11 = arith.constant 0 : index
    %18 = vector.load %arg5[%c0_10, %c0_11] : memref<32x1xf32, #tpu.memory_space<vmem>>, vector<32x1xf32>
    %19 = vector.broadcast %18 : vector<32x1xf32> to vector<32x128xf32>
    %20 = arith.addf %17, %19 : vector<32x128xf32>
    %cst_12 = arith.constant 0.000000e+00 : f32
    %21 = vector.broadcast %cst_12 : f32 to vector<32x128xf32>
    %22 = arith.maximumf %20, %21 : vector<32x128xf32>
    %c0_13 = arith.constant 0 : index
    %c0_14 = arith.constant 0 : index
    %23 = vector.load %arg6[%c0_13, %c0_14] : memref<1x32xf32, #tpu.memory_space<vmem>>, vector<1x32xf32>
    %cst_15 = arith.constant dense<0.000000e+00> : vector<1x128xf32>
    %24 = tpu.matmul %23, %22, %cst_15 {dimension_numbers = #tpu.dot_dimension_numbers<[1], [0], [0], [1], [0, 0, 1, 1], [], []>} : vector<1x32xf32>, vector<32x128xf32>, vector<1x128xf32> -> vector<1x128xf32>
    %c0_16 = arith.constant 0 : index
    %c0_17 = arith.constant 0 : index
    %25 = vector.load %arg7[%c0_16, %c0_17] : memref<1x1xf32, #tpu.memory_space<vmem>>, vector<1x1xf32>
    %26 = vector.broadcast %25 : vector<1x1xf32> to vector<1x128xf32>
    %27 = arith.addf %24, %26 : vector<1x128xf32>
    %cst_18 = arith.constant 0.000000e+00 : f32
    %28 = vector.broadcast %cst_18 : f32 to vector<1x128xf32>
    %29 = arith.subf %28, %27 : vector<1x128xf32>
    %30 = math.exp %29 : vector<1x128xf32>
    %cst_19 = arith.constant 1.000000e+00 : f32
    %31 = vector.broadcast %cst_19 : f32 to vector<1x128xf32>
    %32 = arith.addf %31, %30 : vector<1x128xf32>
    %cst_20 = arith.constant 1.000000e+00 : f32
    %33 = vector.broadcast %cst_20 : f32 to vector<1x128xf32>
    %34 = arith.divf %33, %32 : vector<1x128xf32>
    %c0_21 = arith.constant 0 : index
    %c0_22 = arith.constant 0 : index
    %35 = vector.load %arg8[%c0_21, %c0_22] : memref<1x128xf32, #tpu.memory_space<vmem>>, vector<1x128xf32>
    tpu.vector_store %arg8[%c0_21, %c0_22], %34 {strides = array<i32>} : memref<1x128xf32, #tpu.memory_space<vmem>>, vector<1x128xf32>,
    return
  }
  func.func @transform_0(%arg0: i32) -> (i32, i32) {
    %c0_i32 = arith.constant 0 : i32
    %c0_i32_0 = arith.constant 0 : i32
    return %arg0, %c0_i32 : i32, i32
  }
  func.func @transform_1(%arg0: i32) -> (i32, i32) {
    %c0_i32 = arith.constant 0 : i32
    %c0_i32_0 = arith.constant 0 : i32
    %c0_i32_1 = arith.constant 0 : i32
    return %c0_i32, %c0_i32_0 : i32, i32
  }
  func.func @transform_2(%arg0: i32) -> (i32, i32) {
    %c0_i32 = arith.constant 0 : i32
    %c0_i32_0 = arith.constant 0 : i32
    %c0_i32_1 = arith.constant 0 : i32
    return %c0_i32, %c0_i32_0 : i32, i32
  }
  func.func @transform_3(%arg0: i32) -> (i32, i32) {
    %c0_i32 = arith.constant 0 : i32
    %c0_i32_0 = arith.constant 0 : i32
    %c0_i32_1 = arith.constant 0 : i32
    return %c0_i32, %c0_i32_0 : i32, i32
  }
  func.func @transform_4(%arg0: i32) -> (i32, i32) {
    %c0_i32 = arith.constant 0 : i32
    %c0_i32_0 = arith.constant 0 : i32
    %c0_i32_1 = arith.constant 0 : i32
    return %c0_i32, %c0_i32_0 : i32, i32
  }
  func.func @transform_5(%arg0: i32) -> (i32, i32) {
    %c0_i32 = arith.constant 0 : i32
    %c0_i32_0 = arith.constant 0 : i32
    %c0_i32_1 = arith.constant 0 : i32
    return %c0_i32, %c0_i32_0 : i32, i32
  }
  func.func @transform_6(%arg0: i32) -> (i32, i32) {
    %c0_i32 = arith.constant 0 : i32
    %c0_i32_0 = arith.constant 0 : i32
    %c0_i32_1 = arith.constant 0 : i32
    return %c0_i32, %c0_i32_0 : i32, i32
  }
  func.func @transform_7(%arg0: i32) -> (i32, i32) {
    %c0_i32 = arith.constant 0 : i32
    %c0_i32_0 = arith.constant 0 : i32
    return %c0_i32, %arg0 : i32, i32
  }
}

</mosaic_0001>

<bundles_post_ra>
// kernel: tpu_custom_call.1
= control target key start
LH: loop header
LB: loop body
LE: loop exit
PB: predicated region body
PF: predicated region fallthrough
CT: control target
= control target key end

     0   :  { %s1456_s0 = inlined_call_operand.vmem [shape: f32[200,22], index: 0, kind: input, shape index: {}]   ;;  %s1457_s1 = inlined_call_operand.vmem [shape: f32[32,22], index: 1, kind: input, shape index: {}]   ;;  %s1458_s2 = inlined_call_operand.vmem [shape: f32[32,1], index: 2, kind: input, shape index: {}]   ;;  %s1459_s3 = inlined_call_operand.vmem [shape: f32[32,32], index: 3, kind: input, shape index: {}]   ;;  %s1460_s4 = inlined_call_operand.vmem [shape: f32[32,1], index: 4, kind: input, shape index: {}]   ;;  %s1461_s5 = inlined_call_operand.vmem [shape: f32[1,32], index: 5, kind: input, shape index: {}]   ;;  %s1462_s6 = inlined_call_operand.<no memory space> [shape: f32[1,1], index: 6, kind: input, shape index: {}]   ;;  %s1463_s7 = inlined_call_operand.hbm [shape: f32[1,200], index: 7, kind: output, shape index: {}]  }
   0x1   :  { %v12_v0 = vstv %s1462_s6 }
   0x2   :  { %13 = vst [vmem:[#allocation2] sm:$0x1] %v12_v0 }
   0x3   :  { %14 = vsyncpa [#allocation4], 0 }
   0x4   :  { %16 = vsyncpa [#allocation4 + $0x1], 0  ;;  %s1204_s26 = smov 0   ;;  %s1206_s27 = smov 0  }
   0x5   :  { %s1208_s28 = smov 0   ;;  %s1210_s29 = smov 0  }
   0x6 LB: > { %s849_s6 = sadd.s32 4294967295, %s1154_s29   ;;  %s850_s30 = sadd.s32 4294967294, %s1154_s29   ;;  %s1154_s29 = sphi %s1210_s29, %s1471_s29   ;;  %s1150_s28 = sphi %s1208_s28, %s1470_s28   ;;  %s1146_s27 = sphi %s1206_s27, %s1469_s27   ;;  %s1142_s26 = sphi %s1204_s26, %s1468_s26  }
   0x7   : > { %s1227_s8 = sadd.s32 1, %s1154_s29   ;;  %s181_s9 = sadd.s32 1, %s1150_s28 }
   0x8   : > { %s178_s10 = ssub.s32 %s1154_s29, %s1227_s8  ;;  %p191_p0 = scmp.ne.s32.totalorder %s1150_s28, %s1146_s27 }
   0x9   : > { %p179_p1 = scmp.eq.s32.totalorder %s178_s10, 0  ;;  %p192_p2 = scmp.eq.s32.totalorder %s849_s6, 1 }
   0xa   : > { %p197_p3 = scmp.ne.s32.totalorder %s1146_s27, %s1142_s26  ;;  %p198_p4 = scmp.eq.s32.totalorder %s850_s30, 1 }
   0xb   : > { %s1237_s11 = scalar_select %p179_p1, %s1150_s28, %s181_s9  }
   0xc   : > { %p1239_p5 = por %p192_p2, %p191_p0  ;;  %p1243_p6 = por %p198_p4, %p197_p3 }
   0xd   : > { %p853_p7 = scmp.ge.s32.totalorder %s1154_s29, 1  ;;  %p251_p8 = scmp.lt.s32.totalorder %s1154_s29, 3 }
   0xf   : > { %p252_p9 = pnand %p853_p7, %p251_p8 }
  0x10   : > { %s1249_s14 = sshll.u32 (!%p252_p9), %s849_s6, 4  ;;  %v316_v1 = vlaneseq (!%p252_p9)  ;;  %s856_s15 = sshll.u32 (!%p252_p9), %s849_s6, 7  ;;  %vm411_vm0 = vcmask (!%p252_p9), 179200   ;;  %v383_v2 = vld [vmem:[%s1457_s1] sm:$0xff] (!%p252_p9)  ;;  %v1156_v6 = vmov (!%p252_p9), 0   ;;  %v389_v7 = vld [vmem:[%s1458_s2 + $0x10] sm:$0xff] (!%p252_p9) }
  0x11   : > { %255 = sbr.rel (%p252_p9) target bundleno = 805 (0x325), region = 48  ;;  %p291_p10 = scmp.lt.s32.totalorder (!%p252_p9), %s1249_s14, 24  ;;  %v1255_v3 = vstv (!%p252_p9), %s856_s15  ;;  %950 = vmatprep.mubr.msk.f32.mxu0 (!%p252_p9), %vm411_vm0, %v383_v2  ;;  %v387_v4 = vld [vmem:[%s1458_s2] sm:$0xff] (!%p252_p9)  ;;  %1086 = vset.pattern.permute.xlu0 (!%p252_p9), %v1156_v6  ;;  %v388_v12 = vld [vmem:[%s1458_s2 + $0x8] sm:$0xff] (!%p252_p9)  ;;  %v390_v15 = vld [vmem:[%s1458_s2 + $0x18] sm:$0xff] (!%p252_p9) }
  0x12   : > { %v1261_v5 = vshrl.u32 (!%p252_p9), %v316_v1, 7  ;;  %1087 = vset.pattern.permute.xlu1 (!%p252_p9), %v1156_v6  ;;  %393 = vperm.xlu0 (!%p252_p9), %1086, %v387_v4   ;;  %v565_v26 = vld [vmem:[%s1460_s4] sm:$0xff] (!%p252_p9)  ;;  %vm1299_vm5 = vmpackc.low (!%p252_p9), %vm411_vm0, %vm411_vm0  ;;  %v566_v31 = vld [vmem:[%s1460_s4 + $0x8] sm:$0xff] (!%p252_p9)  ;;  %s1160_s18 = smov (!%p252_p9), [#allocation3]  }
  0x13   : > { %403 = vperm.xlu1 (!%p252_p9), %1087, %v389_v7   ;;  %v567_v34 = vld [vmem:[%s1460_s4 + $0x10] sm:$0xff] (!%p252_p9)  ;;  %v568_v39 = vld [vmem:[%s1460_s4 + $0x18] sm:$0xff] (!%p252_p9)  ;;  %v692_v44 = vld [vmem:[#allocation2] sm:$0x1] (!%p252_p9)  ;;  %s1096_s19 = sshll.u32 (!%p252_p9), %s1160_s18, 4  ;;  %s1097_s19 = int_to_ptr.vmem [resolvable:$false] %s1096_s19 }
  0x14   : > { %v318_v8 = vadd.s32 (!%p252_p9), 8, %v1261_v5  ;;  %v335_v9 = vadd.s32 (!%p252_p9), %v1255_v3, %v1261_v5  ;;  %v319_v10 = vadd.s32 (!%p252_p9), 16, %v1261_v5  ;;  %v320_v11 = vadd.s32 (!%p252_p9), 24, %v1261_v5  ;;  %s1098_s20 = scalar_lea.vmem (!%p252_p9), %s1097_s19, 32 }
  0x15   : > { %v321_v13 = vadd.s32 (!%p252_p9), 32, %v1261_v5  ;;  %v322_v14 = vadd.s32 (!%p252_p9), 40, %v1261_v5  ;;  %v323_v37 = vadd.s32 (!%p252_p9), 48, %v1261_v5  ;;  %v324_v38 = vadd.s32 (!%p252_p9), 56, %v1261_v5 }
  0x16   : > { %v336_v16 = vadd.s32 (!%p252_p9), %v1255_v3, %v318_v8  ;;  %vm351_vm1 = vcmp.lt.s32.totalorder (!%p252_p9), %v335_v9, 200  ;;  %v337_v17 = vadd.s32 (!%p252_p9), %v1255_v3, %v319_v10  ;;  %v338_v18 = vadd.s32 (!%p252_p9), %v1255_v3, %v320_v11  ;;  %398 = vperm.xlu0 (!%p252_p9), %1086, %v388_v12  }
  0x17   : > { %v339_v22 = vadd.s32 (!%p252_p9), %v1255_v3, %v321_v13  ;;  %v340_v23 = vadd.s32 (!%p252_p9), %v1255_v3, %v322_v14  ;;  %408 = vperm.xlu1 (!%p252_p9), %1087, %v390_v15   ;;  %v341_v42 = vadd.s32 (!%p252_p9), %v1255_v3, %v323_v37  ;;  %v342_v43 = vadd.s32 (!%p252_p9), %v1255_v3, %v324_v38 }
  0x18   : > { %s292_s22 = scalar_select %p291_p10, %s1249_s14, 24  ;;  %vm352_vm2 = vcmp.lt.s32.totalorder %v336_v16, 200  ;;  %vm353_vm3 = vcmp.lt.s32.totalorder %v337_v17, 200  ;;  %vm354_vm4 = vcmp.lt.s32.totalorder %v338_v18, 200  ;;  %v325_v48 = vadd.s32 64, %v1261_v5 }
  0x19   : > { %vm355_vm6 = vcmp.lt.s32.totalorder %v339_v22, 200  ;;  %vm356_vm7 = vcmp.lt.s32.totalorder %v340_v23, 200  ;;  %vm357_vm8 = vcmp.lt.s32.totalorder %v341_v42, 200  ;;  %vm358_vm9 = vcmp.lt.s32.totalorder %v342_v43, 200 }
  0x1a   : > { %s855_s25 = sshll.u32 %s292_s22, 3  ;;  %571 = vperm.xlu0 %1086, %v565_v26   ;;  %v326_v49 = vadd.s32 72, %v1261_v5  ;;  %v343_v52 = vadd.s32 %v1255_v3, %v325_v48  ;;  %v327_v57 = vadd.s32 80, %v1261_v5  ;;  %v328_v58 = vadd.s32 88, %v1261_v5  ;;  %v386_v26 = vld [vmem:[%s1457_s1 + $0x18] sm:$0xff] }
  0x1b   : > { %s1283_s15 = scalar_lea.vmem %s1456_s0, %s855_s25  ;;  %576 = vperm.xlu1 %1087, %v566_v31   ;;  %v329_v2 = vadd.s32 96, %v1261_v5  ;;  %v330_v4 = vadd.s32 104, %v1261_v5  ;;  %v331_v13 = vadd.s32 112, %v1261_v5  ;;  %v332_v14 = vadd.s32 120, %v1261_v5  ;;  %v564_v48 = vld [vmem:[%s1459_s3 + $0x18] sm:$0xff]  ;;  %s284_s25 = sand.u32 1, %s1146_s27  }
  0x1c   : > { %v300_v19 = vld [vmem:[%s1283_s15] sm:$0xff]  ;;  %v301_v20 = vld [vmem:[%s1283_s15 + $0x8] sm:$0xff]  ;;  %v302_v21 = vld [vmem:[%s1283_s15 + $0x10] sm:$0xff]  ;;  %v344_v53 = vadd.s32 %v1255_v3, %v326_v49  ;;  %vm359_vm10 = vcmp.lt.s32.totalorder %v343_v52, 200  ;;  %v345_v61 = vadd.s32 %v1255_v3, %v327_v57  ;;  %v346_v62 = vadd.s32 %v1255_v3, %v328_v58  ;;  %s285_s6 = scalar_lea.vmem [#allocation3], %s284_s25  ;;  %s783_s16 = scalar_lea.sflag [#allocation4], %s284_s25 }
  0x1d   : > { %v367_v24 = vsel %vm351_vm1, %v300_v19, 0.0  ;;  %v303_v25 = vld [vmem:[%s1283_s15 + $0x18] sm:$0xff]  ;;  %v368_v27 = vsel %vm352_vm2, %v301_v20, 0.0  ;;  %v369_v29 = vsel %vm353_vm3, %v302_v21, 0.0  ;;  %v304_v35 = vld [vmem:[%s1283_s15 + $0x20] sm:$0xff]  ;;  %v305_v36 = vld [vmem:[%s1283_s15 + $0x28] sm:$0xff]  ;;  %v347_v8 = vadd.s32 %v1255_v3, %v329_v2 }
  0x1e   : > { %v370_v30 = vsel %vm354_vm4, %v303_v25, 0.0  ;;  %v981_v32 = vpack.c.bf16 %v368_v27, %v367_v24  ;;  %v371_v40 = vsel %vm355_vm6, %v304_v35, 0.0  ;;  %v372_v41 = vsel %vm356_vm7, %v305_v36, 0.0  ;;  %581 = vperm.xlu0 %1086, %v567_v34   ;;  %v306_v46 = vld [vmem:[%s1283_s15 + $0x30] sm:$0xff]  ;;  %v307_v47 = vld [vmem:[%s1283_s15 + $0x38] sm:$0xff]  ;;  %v308_v55 = vld [vmem:[%s1283_s15 + $0x40] sm:$0xff] }
  0x1f   : > { %v987_v33 = vpack.c.bf16 %v370_v30, %v369_v29  ;;  %586 = vperm.xlu1 %1087, %v568_v39   ;;  %v993_v45 = vpack.c.bf16 %v372_v41, %v371_v40  ;;  %v373_v50 = vsel %vm357_vm8, %v306_v46, 0.0  ;;  %v374_v51 = vsel %vm358_vm9, %v307_v47, 0.0  ;;  %v309_v56 = vld [vmem:[%s1283_s15 + $0x48] sm:$0xff]  ;;  %v310_v0 = vld [vmem:[%s1283_s15 + $0x50] sm:$0xff]  ;;  %v311_v1 = vld [vmem:[%s1283_s15 + $0x58] sm:$0xff]  ;;  %s795_s30 = sshll.u32 %s285_s6, 4  ;;  %s1416_s30 = int_to_ptr.vmem [resolvable:$true] %s795_s30 }
  0x20   : > { %983 = vmatprep.subr.msk.bf16.mxu0 %vm1299_vm5, %v981_v32  ;;  %v999_v54 = vpack.c.bf16 %v374_v51, %v373_v50  ;;  %vm360_vm11 = vcmp.lt.s32.totalorder %v344_v53, 200  ;;  %v375_v59 = vsel %vm359_vm10, %v308_v55, 0.0  ;;  %vm361_vm12 = vcmp.lt.s32.totalorder %v345_v61, 200  ;;  %v312_v11 = vld [vmem:[%s1283_s15 + $0x60] sm:$0xff]  ;;  %v313_v12 = vld [vmem:[%s1283_s15 + $0x68] sm:$0xff]  ;;  %v314_v20 = vld [vmem:[%s1283_s15 + $0x70] sm:$0xff]  ;;  %p1099_p0 = scmp.lt.s32.totalorder %s1416_s30, %s1097_s19 }
  0x21   : > { %986 = vmatpush3.bf16.xpose.msk.msra.mxu0 %vm1299_vm5, %v981_v32  ;;  %v376_v60 = vsel %vm360_vm11, %v309_v56, 0.0  ;;  %vm362_vm13 = vcmp.lt.s32.totalorder %v346_v62, 200  ;;  %v377_v6 = vsel %vm361_vm12, %v310_v0, 0.0  ;;  %v348_v9 = vadd.s32 %v1255_v3, %v330_v4  ;;  %v315_v21 = vld [vmem:[%s1283_s15 + $0x78] sm:$0xff]  ;;  %v385_v25 = vld [vmem:[%s1457_s1 + $0x10] sm:$0xff]  ;;  %v561_v27 = vld [vmem:[%s1459_s3] sm:$0xff]  ;;  %s1414_s15 = scalar_lea.hbm %s1463_s7, %s1249_s14 }
  0x22   : > { %989 = vmatprep.subr.msk.bf16.mxu0 %vm1299_vm5, %v987_v33  ;;  %695 = vperm.xlu0 %1086, %v692_v44   ;;  %v1005_v63 = vpack.c.bf16 %v376_v60, %v375_v59  ;;  %v378_v7 = vsel %vm362_vm13, %v311_v1, 0.0  ;;  %vm363_vm14 = vcmp.lt.s32.totalorder %v347_v8, 200  ;;  %v349_v17 = vadd.s32 %v1255_v3, %v331_v13  ;;  %v562_v46 = vld [vmem:[%s1459_s3 + $0x8] sm:$0xff]  ;;  %v563_v47 = vld [vmem:[%s1459_s3 + $0x10] sm:$0xff]  ;;  %s1092_s17 = scalar_lea.vmem %s1416_s30, 16 }
  0x23   : > { %v1011_v10 = vpack.c.bf16 %v378_v7, %v377_v6  ;;  %vm364_vm15 = vcmp.lt.s32.totalorder %v348_v9, 200  ;;  %v379_v15 = vsel %vm363_vm14, %v312_v11, 0.0  ;;  %v350_v18 = vadd.s32 %v1255_v3, %v332_v14  ;;  %v384_v3 = vld [vmem:[%s1457_s1 + $0x8] sm:$0xff]  ;;  %v691_v7 = vld [vmem:[%s1461_s5] sm:$0x1]  ;;  %p1093_p11 = scmp.ne.s32.totalorder %s1416_s30, %s1092_s17  ;;  %p1100_p1 = scmp.lt.s32.totalorder %s1098_s20, %s1092_s17 }
  0x24   : > { %v380_v16 = vsel %vm364_vm15, %v313_v12, 0.0  ;;  %vm365_vm1 = vcmp.lt.s32.totalorder %v349_v17, 200  ;;  %vm589_vm3 = vcmask 261120   ;;  %v1157_v49 = vmov 0.0|0.0  }
  0x25   : > { %v1017_v19 = vpack.c.bf16 %v380_v16, %v379_v15  ;;  %vm366_vm2 = vcmp.lt.s32.totalorder %v350_v18, 200  ;;  %v381_v22 = vsel %vm365_vm1, %v314_v20, 0.0  ;;  %964 = vmatprep.mubr.msk.f32.mxu1 %vm589_vm3, %v561_v27  ;;  %v1159_v50 = vmov 0.0   ;;  %p1094_p12 = pnand %p1093_p11, %p1239_p5  ;;  %p1101_p2 = por %p1100_p1, %p1099_p0 }
  0x26   : > { %v382_v23 = vsel %vm366_vm2, %v315_v21, 0.0  ;;  %v700_v8 = vsub.s32 0, %v1261_v5 }
  0x27   : > { %v1023_v24 = vpack.c.bf16 %v382_v23, %v381_v22  ;;  %p1095_p13 = pneg %p1094_p12 }
  0x29   : > { %992 = vmatpush3.bf16.xpose.msk.msra.mxu0 %vm1299_vm5, %v987_v33  ;;  %p1102_p3 = pnand %p1101_p2, %p1095_p13 }
  0x2a   : > { %995 = vmatprep.subr.msk.bf16.mxu0 %vm1299_vm5, %v993_v45 }
  0x31   : > { %998 = vmatpush3.bf16.xpose.msk.msra.mxu0 %vm1299_vm5, %v993_v45 }
  0x32   : > { %1001 = vmatprep.subr.msk.bf16.mxu0 %vm1299_vm5, %v999_v54 }
  0x39   : > { %1004 = vmatpush3.bf16.xpose.msk.msra.mxu0 %vm1299_vm5, %v999_v54 }
  0x3a   : > { %1007 = vmatprep.subr.msk.bf16.mxu0 %vm1299_vm5, %v1005_v63 }
  0x41   : > { %1010 = vmatpush3.bf16.xpose.msk.msra.mxu0 %vm1299_vm5, %v1005_v63 }
  0x42   : > { %1013 = vmatprep.subr.msk.bf16.mxu0 %vm1299_vm5, %v1011_v10 }
  0x49   : > { %1016 = vmatpush3.bf16.xpose.msk.msra.mxu0 %vm1299_vm5, %v1011_v10 }
  0x4a   : > { %1019 = vmatprep.subr.msk.bf16.mxu0 %vm1299_vm5, %v1017_v19 }
  0x51   : > { %1022 = vmatpush3.bf16.xpose.msk.msra.mxu0 %vm1299_vm5, %v1017_v19 }
  0x52   : > { %1025 = vmatprep.subr.msk.bf16.mxu0 %vm1299_vm5, %v1023_v24 }
  0x59   : > { %1028 = vmatpush3.bf16.xpose.msk.msra.mxu0 %vm1299_vm5, %v1023_v24 }
  0x60   : > { %951 = vmatmul.mubr.msk.f32.vlgmr.msra.gmra.mrb[0].mxu0 %vm411_vm0, %v384_v3 }
  0x61   : > { %953 = vmatprep.mubr.msk.f32.mxu0 %vm411_vm0, %v385_v25 }
  0x64   : > { %954 = vmatmul.mubr.msk.f32.gmra.mrb[2].mxu0 %vm411_vm0, %v386_v26  ;;  %vm1158_vm0 = vmmov 0  }
  0x91   : > { %v394_v28 = vpop.permute.xlu0 %393 }
  0x92   : > { %v404_v29 = vpop.permute.xlu1 %403 }
  0x95   : > { %v399_v30 = vpop.permute.xlu0 %398 }
  0x96   : > { %v409_v36 = vpop.permute.xlu1 %408 }
  0x99   : > { %v572_v52 = vpop.permute.xlu0 %571 }
  0x9a   : > { %v577_v51 = vpop.permute.xlu1 %576 }
  0x9d   : > { %v582_v61 = vpop.permute.xlu0 %581 }
  0x9e   : > { %v587_v58 = vpop.permute.xlu1 %586 }
  0xa1   : > { %v696_v9 = vpop.permute.xlu0 %695 }
  0xa2   : > { %v701_v10 = vrot.slane %v696_v9, %v700_v8 }
 0x133   : > { %v952_v31 = vpop.f32.mrb[0].mxu0 }
 0x134   : > { %v544_v32 = vadd.f32 %v952_v31, %v399_v30  ;;  %v538_v33 = vpop.f32.mrb[1].mxu0 }
 0x135   : > { %v539_v34 = vadd.f32 %v538_v33, %v394_v28 }
 0x136   : > { %v558_v35 = vmax.f32 %v544_v32, 0.0 }
 0x137   : > { %v557_v37 = vmax.f32 %v539_v34, 0.0  ;;  %v955_v38 = vpop.f32.mrb[2].mxu0 }
 0x138   : > { %v554_v39 = vadd.f32 %v955_v38, %v409_v36  ;;  %v548_v40 = vpop.f32.mrb[3].mxu0 }
 0x139   : > { %v549_v41 = vadd.f32 %v548_v40, %v404_v29  ;;  %v1029_v42 = vpack.c.bf16 %v558_v35, %v557_v37 }
 0x13a   : > { %v560_v43 = vmax.f32 %v554_v39, 0.0 }
 0x13b   : > { %v559_v44 = vmax.f32 %v549_v41, 0.0  ;;  %1030 = vmatprep.subr.bf16.mxu1 %v1029_v42 }
 0x13c   : > { %1032 = vmatpush3.bf16.msra.mxu1 %v1029_v42 }
 0x13d   : > { %v1033_v45 = vpack.c.bf16 %v560_v43, %v559_v44 }
 0x13f   : > { %1034 = vmatprep.subr.bf16.mxu1 %v1033_v45 }
 0x140   : > { %1036 = vmatpush3.bf16.msra.mxu1 %v1033_v45 }
 0x141   : > { %1037 = vmatprep.subr.bf16.mxu1 %v1157_v49 }
 0x143   : > { %965 = vmatmul.mubr.msk.f32.vlgmr.msra.gmra.mrb[0].mxu1 %vm589_vm3, %v562_v46 }
 0x144   : > { %967 = vmatprep.mubr.msk.f32.mxu1 %vm589_vm3, %v563_v47 }
 0x147   : > { %968 = vmatmul.mubr.msk.f32.gmra.mrb[2].mxu1 %vm589_vm3, %v564_v48 }
 0x148   : > { %978 = vmatprep.mubr.msk.f32.mxu1 %vm1158_vm0, %v1159_v50 }
 0x216   : > { %v966_v53 = vpop.f32.mrb[0].mxu1 }
 0x217   : > { %v674_v54 = vadd.f32 %v966_v53, %v577_v51  ;;  %v668_v55 = vpop.f32.mrb[1].mxu1 }
 0x218   : > { %v669_v56 = vadd.f32 %v668_v55, %v572_v52 }
 0x219   : > { %v688_v57 = vmax.f32 %v674_v54, 0.0 }
 0x21a   : > { %v687_v59 = vmax.f32 %v669_v56, 0.0  ;;  %v969_v60 = vpop.f32.mrb[2].mxu1 }
 0x21b   : > { %v684_v62 = vadd.f32 %v969_v60, %v587_v58  ;;  %v678_v63 = vpop.f32.mrb[3].mxu1 }
 0x21c   : > { %v1038_v0 = vpack.c.bf16 %v688_v57, %v687_v59  ;;  %v679_v1 = vadd.f32 %v678_v63, %v582_v61 }
 0x21d   : > { %v690_v2 = vmax.f32 %v684_v62, 0.0 }
 0x21e   : > { %v689_v4 = vmax.f32 %v679_v1, 0.0  ;;  %1039 = vmatpush3.bf16.msra.mxu1 %v1038_v0 }
 0x21f   : > { %1040 = vmatprep.subr.bf16.mxu1 %v1157_v49 }
 0x220   : > { %v1041_v6 = vpack.c.bf16 %v690_v2, %v689_v4 }
 0x222   : > { %1042 = vmatpush3.bf16.msra.mxu1 %v1041_v6 }
 0x225   : > { %979 = vmatmul.mubr.msk.f32.vlgmr.msra.gmra.mrb[4].mxu1 %vm589_vm3, %v691_v7 }
 0x2f8   : > { %v771_v11 = vpop.f32.mrb[4].mxu1 }
 0x2f9   : > { %v772_v12 = vadd.f32 %v771_v11, %v701_v10  ;;  %v980_v13 = vpop.f32.mrb[5].mxu1 }
 0x2fb   : > { %v775_v14 = vsub.f32 0.0, %v772_v12 }
 0x2fd   : > { %v776_v15 = vmul.f32 1.442695, %v775_v14 }
 0x2ff   : > { %1088 = vpow2.f32 %v776_v15 }
 0x309   : > { %v1089_v16 = vpop.eup %1088 }
 0x30a   : > { %v778_v17 = vadd.f32 1.0, %v1089_v16 }
 0x30c   : > { %1090 = vrcp.f32 %v778_v17 }
 0x316   : > { %v1091_v5 = vpop.eup %1090 }
 0x317   : > { %781 = vst [vmem:[%s285_s6] sm:$0x1] %v1091_v5 }
 0x318   : > { %1105 = shalt.err (!%p1102_p3)
}
 0x319   : > { %s1106_s14 = scalar_lea.hbm %s1414_s15, 16  ;;  %s1110_s23 = scalar_lea.hbm %s1463_s7, 32 }
 0x31a   : > { %p1107_p4 = scmp.ne.s32.totalorder %s1414_s15, %s1106_s14  ;;  %p1111_p9 = scmp.lt.u32.totalorder %s1414_s15, %s1463_s7 }
 0x31b   : > { %p1112_p10 = scmp.lt.u32.totalorder %s1110_s23, %s1106_s14  ;;  %p1114_p12 = scmp.lt.u32.totalorder %s1106_s14, %s1414_s15 }
 0x31c   : > { %p1108_p7 = pnand %p1107_p4, %p1239_p5 }
 0x31d   : > { %p1113_p11 = por %p1112_p10, %p1111_p9 }
 0x31e   : > { %p1109_p8 = pneg %p1108_p7 }
 0x31f   : > { %p1115_p13 = por %p1114_p12, %p1113_p11 }
 0x321   : > { %p1116_p0 = pnand %p1115_p13, %p1109_p8 }
 0x323   : > { %1119 = shalt.err (!%p1116_p0)
}
 0x324   : > { %1043 = dma.vmem_to_hbm [thread:$0]  (%p1239_p5), %s1416_s30, 16, %s1414_s15, %s783_s16  }
 0x325 PF: > { %p1049_p1 = scmp.ge.s32.totalorder %s1154_s29, 2  ;;  %s807_s6 = sand.u32 1, %s1142_s26  }
 0x326   : > { %s808_s9 = scalar_lea.sflag [#allocation4], %s807_s6 }
 0x327   : > { %p1046_p2 = pnand %p1049_p1, %p1243_p6 }
 0x329   : > { %1137 = dma.done.wait (!%p1046_p2), %s808_s9, 16  }
 0x32a   : > { %1139 = vsyncadd (!%p1046_p2), %s808_s9, 4294967280  ;;  %p19_p3 = scmp.ge.s32.totalorder %s1227_s8, 4   ;;  %s1468_s26 = smov %s1146_s27 }
 0x32b   : > { %s1469_s27 = smov %s1150_s28  ;;  %s1470_s28 = smov %s1237_s11 }
 0x32c   : > { %s1471_s29 = smov %s1227_s8  ;;  %21 = sbr.rel (!%p19_p3) target bundleno = 6 (0x6), region = 83 }
 0x333   :  { %812 = vsyncpa [#allocation4], 1 }
 0x334   :  { %814 = vsyncpa [#allocation4 + $0x1], 1 }

</bundles_post_ra>
